<compile_context>
chip_gen: v7x
topology: tpu7x:2x2x1
jax: 0.10.0
libtpu: 0.0.40
codegen_flags: <defaults>
</compile_context>

<pallas_src>
import jax
import jax.numpy as jnp
from jax import lax
from jax.experimental import pallas as pl
from jax.experimental.pallas import tpu as pltpu

EPS = 1e-5
LANE = 128
SUBLANE = 8
VMEM_LIMIT = 48 * 1024 * 1024   # stays under v7x's 64 MiB physical VMEM per TC


def _round_up(x, m):
    return (x + m - 1) // m * m


def _pick_block_rows(hp, requested=None):
    if requested is not None:
        if hp % requested != 0:
            raise ValueError(f"block_rows={requested} must divide Hp={hp}")
        return requested
    # Largest divisor of Hp <= 32 keeps per-step working set modest.
    # TODO(synk): derive from a per-generation VMEM budget (v7x: 64 MiB / TC).
    for tr in range(min(hp, 32), 0, -1):
        if hp % tr == 0:
            return tr
    return hp


def _compiler_params():
    return pltpu.CompilerParams(
        dimension_semantics=("parallel", "parallel"),
        vmem_limit_bytes=VMEM_LIMIT)


def down_forward(x_nchw, params, conv_dtype=jnp.bfloat16, out_dtype=jnp.float32,
                 block_rows=None):
    """Down.forward: NCHW in -> NCHW out with halved spatial dims.

    conv_dtype=bfloat16 (default): bf16 MXU operands, f32 accumulation
    (recommended on v6e/v7x).  conv_dtype=float32 is faithful to the float32
    PyTorch module.  BatchNorm uses batch statistics (training mode).
    """
    N, Cin, H, W = x_nchw.shape
    Hp, Wp = H // 2, W // 2
    w1, g1, be1 = params["w1"], params["g1"], params["be1"]
    w2, g2, be2 = params["w2"], params["g2"], params["be2"]
    Cmid, Cout = w1.shape[0], w2.shape[0]
    Cin_p = _round_up(Cin, LANE)
    Cmid_p = _round_up(Cmid, LANE)
    Cout_p = _round_up(Cout, LANE)
    Wt = _round_up(Wp + 2, SUBLANE)        # padded width: 1-col halo + sublane tail
    TR = _pick_block_rows(Hp, block_rows)  # rows per grid step
    nRB = Hp // TR
    cdt = conv_dtype

    # ------------- XLA glue: maxpool (hoisted) + layout prep -------------
    x_nhwc = jnp.transpose(x_nchw, (0, 2, 3, 1))
    pooled = lax.reduce_window(x_nhwc, -jnp.inf, lax.max,
                               (1, 2, 2, 1), (1, 2, 2, 1), "VALID")
    pooled = pooled.astype(cdt)
    # zero halo (= the conv's padding=1) + channel lane padding + sublane tail.
    pooled_p = jnp.pad(pooled, ((0, 0), (1, 1), (1, Wt - Wp - 1), (0, Cin_p - Cin)))

    # conv weights in per-dy layout: (3, 3*C_p, Cout_p), rows ordered (dx, c_in).
    def prep_w(w, cin, cin_p, cout, cout_p):
        wt = jnp.transpose(w, (2, 3, 1, 0))                       # (3,3,cin,cout)
        wt = jnp.pad(wt, ((0, 0), (0, 0), (0, cin_p - cin), (0, cout_p - cout)))
        return wt.reshape(3, 3 * cin_p, cout_p).astype(cdt)

    w1k = prep_w(w1, Cin, Cin_p, Cmid, Cmid_p)
    w2k = prep_w(w2, Cmid, Cmid_p, Cout, Cout_p)
    # Conv biases b1/b2 are intentionally NOT sent to the chip: a per-channel
    # constant cancels exactly in training-mode BatchNorm's (x - mean).

    # ------------- stage A: conv1 (per-dy matmuls) + BN1 partials -------------
    def conv1_kernel(xp_hbm, w_ref, y_ref, st_ref, xbuf, sem):
        n, r = pl.program_id(0), pl.program_id(1)
        cp = pltpu.make_async_copy(xp_hbm.at[n, pl.ds(r * TR, TR + 2)], xbuf, sem)
        cp.start()
        cp.wait()
        acc = jnp.zeros((TR * Wp, Cmid_p), jnp.float32)
        for dy in range(3):
            slab = jnp.concatenate(
                [xbuf[dy:dy + TR, dx:dx + Wp, :].reshape(TR * Wp, Cin_p)
                 for dx in range(3)], axis=-1)
            acc = acc + jnp.dot(slab, w_ref[dy], preferred_element_type=jnp.float32)
        st_ref[0, 0] = jnp.concatenate(
            [jnp.sum(acc, axis=0, keepdims=True),
             jnp.sum(acc * acc, axis=0, keepdims=True)], axis=0)
        # pre-BN conv1 stored with zero halo columns so stage B windows are
        # already conv-padded along W; one full-width (unmasked) store.
        data = acc.reshape(TR, Wp, Cmid_p).astype(y_ref.dtype)
        left = jnp.zeros((TR, 1, Cmid_p), y_ref.dtype)
        right = jnp.zeros((TR, Wt - Wp - 1, Cmid_p), y_ref.dtype)
        y_ref[0] = jnp.concatenate([left, data, right], axis=1)

    y1, st1 = pl.pallas_call(
        conv1_kernel,
        grid=(N, nRB),
        out_shape=(jax.ShapeDtypeStruct((N, Hp, Wt, Cmid_p), cdt),
                   jax.ShapeDtypeStruct((N, nRB, 2, Cmid_p), jnp.float32)),
        in_specs=[pl.BlockSpec(memory_space=pl.ANY),
                  pl.BlockSpec((3, 3 * Cin_p, Cmid_p), lambda n, r: (0, 0, 0))],
        out_specs=(pl.BlockSpec((1, TR, Wt, Cmid_p), lambda n, r: (n, r, 0, 0)),
                   pl.BlockSpec((1, 1, 2, Cmid_p), lambda n, r: (n, r, 0, 0))),
        scratch_shapes=[pltpu.VMEM((TR + 2, Wt, Cin_p), cdt),
                        pltpu.SemaphoreType.DMA],
        compiler_params=_compiler_params(),
    )(pooled_p, w1k)

    # ------------- XLA glue: global BN stats -> folded scale / shift -------------
    cnt = float(N * Hp * Wp)

    def fold_bn(st, gamma, beta, c, c_p):
        s = jnp.sum(st[:, :, 0, :], axis=(0, 1))
        ss = jnp.sum(st[:, :, 1, :], axis=(0, 1))
        mu = s / cnt
        var = jnp.maximum(ss / cnt - mu * mu, 0.0)
        g = jnp.zeros((c_p,), jnp.float32).at[:c].set(gamma.astype(jnp.float32))
        b = jnp.zeros((c_p,), jnp.float32).at[:c].set(beta.astype(jnp.float32))
        scale = g * lax.rsqrt(var + EPS)
        shift = b - mu * scale
        return scale.reshape(1, c_p), shift.reshape(1, c_p)

    sc1, sh1 = fold_bn(st1, g1, be1, Cmid, Cmid_p)

    # 1-row zero halo for stage B's row windows (re-zeroed in-kernel AFTER the
    # BN scale/shift so the conv2 padding is a true zero of h1).
    y1p = jnp.pad(y1, ((0, 0), (1, 1), (0, 0), (0, 0)))

    # ------------- stage B: BN1+ReLU -> conv2 (per-dy) + BN2 partials -------------
    def conv2_kernel(yp_hbm, sc_ref, sh_ref, w_ref, y_ref, st_ref, ybuf, sem):
        n, r = pl.program_id(0), pl.program_id(1)
        cp = pltpu.make_async_copy(yp_hbm.at[n, pl.ds(r * TR, TR + 2)], ybuf, sem)
        cp.start()
        cp.wait()
        # folded BN1 + ReLU, elementwise in f32 (v5e has no bf16 VPU).
        z = (ybuf[...].astype(jnp.float32) * sc_ref[...].reshape(1, 1, Cmid_p)
             + sh_ref[...].reshape(1, 1, Cmid_p))
        h = jnp.maximum(z, 0.0)
        # conv2 padding must be zeros of h1 (post BN+ReLU), not of y1.
        rows = lax.broadcasted_iota(jnp.int32, (TR + 2, Wt, 1), 0) + r * TR
        cols = lax.broadcasted_iota(jnp.int32, (TR + 2, Wt, 1), 1)
        valid = (rows >= 1) & (rows <= Hp) & (cols >= 1) & (cols <= Wp)
        h = jnp.where(valid, h, 0.0).astype(cdt)
        acc = jnp.zeros((TR * Wp, Cout_p), jnp.float32)
        for dy in range(3):
            slab = jnp.concatenate(
                [h[dy:dy + TR, dx:dx + Wp, :].reshape(TR * Wp, Cmid_p)
                 for dx in range(3)], axis=-1)
            acc = acc + jnp.dot(slab, w_ref[dy], preferred_element_type=jnp.float32)
        st_ref[0, 0] = jnp.concatenate(
            [jnp.sum(acc, axis=0, keepdims=True),
             jnp.sum(acc * acc, axis=0, keepdims=True)], axis=0)
        y_ref[0] = acc.reshape(TR, Wp, Cout_p).astype(y_ref.dtype)

    y2, st2 = pl.pallas_call(
        conv2_kernel,
        grid=(N, nRB),
        out_shape=(jax.ShapeDtypeStruct((N, Hp, Wp, Cout_p), cdt),
                   jax.ShapeDtypeStruct((N, nRB, 2, Cout_p), jnp.float32)),
        in_specs=[pl.BlockSpec(memory_space=pl.ANY),
                  pl.BlockSpec((1, Cmid_p), lambda n, r: (0, 0)),
                  pl.BlockSpec((1, Cmid_p), lambda n, r: (0, 0)),
                  pl.BlockSpec((3, 3 * Cmid_p, Cout_p), lambda n, r: (0, 0, 0))],
        out_specs=(pl.BlockSpec((1, TR, Wp, Cout_p), lambda n, r: (n, r, 0, 0)),
                   pl.BlockSpec((1, 1, 2, Cout_p), lambda n, r: (n, r, 0, 0))),
        scratch_shapes=[pltpu.VMEM((TR + 2, Wt, Cmid_p), cdt),
                        pltpu.SemaphoreType.DMA],
        compiler_params=_compiler_params(),
    )(y1p, sc1, sh1, w2k)

    sc2, sh2 = fold_bn(st2, g2, be2, Cout, Cout_p)

    # ------------- stage C: BN2 + ReLU normalize pass (lane-dense) -------------
    def bn_relu_kernel(y_ref, sc_ref, sh_ref, o_ref):
        z = (y_ref[...].astype(jnp.float32) * sc_ref[...].reshape(1, 1, 1, Cout_p)
             + sh_ref[...].reshape(1, 1, 1, Cout_p))
        o_ref[...] = jnp.maximum(z, 0.0).astype(o_ref.dtype)

    out_nhwc = pl.pallas_call(
        bn_relu_kernel,
        grid=(N, nRB),
        out_shape=jax.ShapeDtypeStruct((N, Hp, Wp, Cout_p), out_dtype),
        in_specs=[pl.BlockSpec((1, TR, Wp, Cout_p), lambda n, r: (n, r, 0, 0)),
                  pl.BlockSpec((1, Cout_p), lambda n, r: (0, 0)),
                  pl.BlockSpec((1, Cout_p), lambda n, r: (0, 0))],
        out_specs=pl.BlockSpec((1, TR, Wp, Cout_p), lambda n, r: (n, r, 0, 0)),
        compiler_params=_compiler_params(),
    )(y2, sc2, sh2)

    # glue: drop channel lane padding, back to NCHW.
    # TODO(synk): for tiny Cout, pack the output lane-dense instead of padding to 128.
    return jnp.transpose(out_nhwc[..., :Cout], (0, 3, 1, 2))


def ref_down(x, params):
    """Pure-JAX reference matching PyTorch Down.forward (training-mode BN)."""
    y = lax.reduce_window(x, -jnp.inf, lax.max, (1, 1, 2, 2), (1, 1, 2, 2), "VALID")

    def conv(h, w, b):
        o = lax.conv_general_dilated(h, w, (1, 1), ((1, 1), (1, 1)),
                                     dimension_numbers=("NCHW", "OIHW", "NCHW"))
        return o + b[None, :, None, None]

    def bn_relu(h, g, b):
        mu = h.mean(axis=(0, 2, 3), keepdims=True)
        var = ((h - mu) ** 2).mean(axis=(0, 2, 3), keepdims=True)
        z = (h - mu) * lax.rsqrt(var + EPS) * g[None, :, None, None] + b[None, :, None, None]
        return jnp.maximum(z, 0.0)

    h = bn_relu(conv(y, params["w1"], params["b1"]), params["g1"], params["be1"])
    h = bn_relu(conv(h, params["w2"], params["b2"]), params["g2"], params["be2"])
    return h


if __name__ == "__main__":
    N, Cin, H, W = 2, 4, 16, 16    # Down(in_channels=4, out_channels=8)
    Cout = 8
    Cmid = Cout

    key = jax.random.PRNGKey(0)
    ks = jax.random.split(key, 8)
    x = jax.random.normal(ks[0], (N, Cin, H, W), jnp.float32)
    params = dict(
        w1=0.2 * jax.random.normal(ks[1], (Cmid, Cin, 3, 3), jnp.float32),
        b1=0.1 * jax.random.normal(ks[2], (Cmid,), jnp.float32),
        g1=1.0 + 0.1 * jax.random.normal(ks[3], (Cmid,), jnp.float32),
        be1=0.1 * jax.random.normal(ks[4], (Cmid,), jnp.float32),
        w2=0.2 * jax.random.normal(ks[5], (Cout, Cmid, 3, 3), jnp.float32),
        b2=0.1 * jax.random.normal(ks[6], (Cout,), jnp.float32),
        g2=1.0 + 0.05 * jax.random.normal(ks[7], (Cout,), jnp.float32),
        be2=jnp.zeros((Cout,), jnp.float32),
    )

    ref = jax.block_until_ready(ref_down(x, params))

    # f32 MXU operands, 2 row-blocks per image: exercises the halo'd tiling and
    # the cross-tile two-pass BN; faithful to the float32 PyTorch module.
    out = jax.block_until_ready(
        down_forward(x, params, conv_dtype=jnp.float32, block_rows=4))
    assert out.shape == (N, Cout, H // 2, W // 2), out.shape
    if not jnp.allclose(out, ref, atol=1e-4, rtol=1e-4):
        err = float(jnp.max(jnp.abs(out - ref)))
        raise AssertionError(f"Pallas kernel (f32) mismatch vs JAX reference: {err}")

    # Default path: bf16 MXU operands with f32 accumulation (v6e/v7x fast path),
    # single row-block per image (looser numerics).
    out_bf16 = jax.block_until_ready(down_forward(x, params))
    assert out_bf16.shape == out.shape
    assert bool(jnp.all(jnp.isfinite(out_bf16)))
    rel = jnp.linalg.norm(out_bf16 - ref) / (jnp.linalg.norm(ref) + 1e-12)
    if not bool(rel < 0.1):
        raise AssertionError(f"Pallas kernel (bf16) relative error too large: {rel}")

    print("KERNEL_OK")
</pallas_src>

<mosaic_0001>
module attributes {stable_mosaic.version = 11 : i64} {
  func.func @conv1_kernel(%arg0: i32, %arg1: i32, %arg2: memref<2x10x16x128xf32, #tpu.memory_space<any>>, %arg3: memref<3x384x128xf32, #tpu.memory_space<vmem>>, %arg4: memref<1x4x16x128xf32, #tpu.memory_space<vmem>>, %arg5: memref<1x1x2x128xf32, #tpu.memory_space<vmem>>, %arg6: memref<6x16x128xf32, #tpu.memory_space<vmem>>, %arg7: memref<!tpu.dma_semaphore, #tpu.memory_space<semaphore_mem>>) attributes {dimension_semantics = [#tpu.dimension_semantics<parallel>, #tpu.dimension_semantics<parallel>], iteration_bounds = array<i64: 2, 2>, scalar_prefetch = 0 : i64, scratch_operands = 2 : i64, tpu.core_type = #tpu.core_type<tc>, window_params = [{}, {pipeline_mode = #tpu.pipeline_mode<synchronous>, transform_indices = @transform_1, window_bounds = array<i64: 3, 384, 128>}, {transform_indices = @transform_2, window_bounds = array<i64: 1, 4, 16, 128>}, {transform_indices = @transform_3, window_bounds = array<i64: 1, 1, 2, 128>}]} {
    %c4_i32 = arith.constant 4 : i32
    %0 = arith.muli %arg1, %c4_i32 : i32
    %c0_i32 = arith.constant 0 : i32
    %c0_i32_0 = arith.constant 0 : i32
    %1 = tpu.memref_slice %arg2[%arg0, %0, %c0_i32, %c0_i32_0] : memref<2x10x16x128xf32, #tpu.memory_space<any>> -> memref<1x6x16x128xf32, #tpu.memory_space<any>>
    %2 = tpu.memref_squeeze %1 : memref<1x6x16x128xf32, #tpu.memory_space<any>> -> memref<6x16x128xf32, #tpu.memory_space<any>>
    tpu.enqueue_dma source(%2 : memref<6x16x128xf32, #tpu.memory_space<any>>) target(%arg6 : memref<6x16x128xf32, #tpu.memory_space<vmem>>) target_semaphore(%arg7 : memref<!tpu.dma_semaphore, #tpu.memory_space<semaphore_mem>>)
    %c0_i32_1 = arith.constant 0 : i32
    %c0_i32_2 = arith.constant 0 : i32
    %3 = tpu.memref_slice %arg2[%arg0, %0, %c0_i32_1, %c0_i32_2] : memref<2x10x16x128xf32, #tpu.memory_space<any>> -> memref<1x6x16x128xf32, #tpu.memory_space<any>>
    %4 = tpu.memref_squeeze %3 : memref<1x6x16x128xf32, #tpu.memory_space<any>> -> memref<6x16x128xf32, #tpu.memory_space<any>>
    tpu.wait_dma2 semaphore(%arg7 : memref<!tpu.dma_semaphore, #tpu.memory_space<semaphore_mem>>) src(%4 : memref<6x16x128xf32, #tpu.memory_space<any>>) dst(%arg6 : memref<6x16x128xf32, #tpu.memory_space<vmem>>)
    %cst = arith.constant 0.000000e+00 : f32
    %5 = vector.broadcast %cst : f32 to vector<32x128xf32>
    %c0 = arith.constant 0 : index
    %c0_3 = arith.constant 0 : index
    %c0_4 = arith.constant 0 : index
    %6 = vector.load %arg6[%c0, %c0_3, %c0_4] : memref<6x16x128xf32, #tpu.memory_space<vmem>>, vector<4x8x128xf32>
    %7 = vector.shape_cast %6 : vector<4x8x128xf32> to vector<32x128xf32>
    %c0_5 = arith.constant 0 : index
    %c1 = arith.constant 1 : index
    %c0_6 = arith.constant 0 : index
    %8 = vector.load %arg6[%c0_5, %c1, %c0_6] : memref<6x16x128xf32, #tpu.memory_space<vmem>>, vector<4x8x128xf32>
    %9 = vector.shape_cast %8 : vector<4x8x128xf32> to vector<32x128xf32>
    %c0_7 = arith.constant 0 : index
    %c2 = arith.constant 2 : index
    %c0_8 = arith.constant 0 : index
    %10 = vector.load %arg6[%c0_7, %c2, %c0_8] : memref<6x16x128xf32, #tpu.memory_space<vmem>>, vector<4x8x128xf32>
    %11 = vector.shape_cast %10 : vector<4x8x128xf32> to vector<32x128xf32>
    %12 = tpu.concatenate %7, %9, %11 in 1 : vector<32x128xf32>, vector<32x128xf32>, vector<32x128xf32> -> vector<32x384xf32>
    %c0_9 = arith.constant 0 : index
    %c0_10 = arith.constant 0 : index
    %c0_11 = arith.constant 0 : index
    %13 = vector.load %arg3[%c0_9, %c0_10, %c0_11] : memref<3x384x128xf32, #tpu.memory_space<vmem>>, vector<1x384x128xf32>
    %14 = vector.shape_cast %13 : vector<1x384x128xf32> to vector<384x128xf32>
    %cst_12 = arith.constant dense<0.000000e+00> : vector<32x128xf32>
    %15 = tpu.matmul %12, %14, %cst_12 {dimension_numbers = #tpu.dot_dimension_numbers<[1], [0], [0], [1], [0, 0, 1, 1], [], []>} : vector<32x384xf32>, vector<384x128xf32>, vector<32x128xf32> -> vector<32x128xf32>
    %16 = arith.addf %5, %15 : vector<32x128xf32>
    %c1_13 = arith.constant 1 : index
    %c0_14 = arith.constant 0 : index
    %c0_15 = arith.constant 0 : index
    %17 = vector.load %arg6[%c1_13, %c0_14, %c0_15] : memref<6x16x128xf32, #tpu.memory_space<vmem>>, vector<4x8x128xf32>
    %18 = vector.shape_cast %17 : vector<4x8x128xf32> to vector<32x128xf32>
    %c1_16 = arith.constant 1 : index
    %c1_17 = arith.constant 1 : index
    %c0_18 = arith.constant 0 : index
    %19 = vector.load %arg6[%c1_16, %c1_17, %c0_18] : memref<6x16x128xf32, #tpu.memory_space<vmem>>, vector<4x8x128xf32>
    %20 = vector.shape_cast %19 : vector<4x8x128xf32> to vector<32x128xf32>
    %c1_19 = arith.constant 1 : index
    %c2_20 = arith.constant 2 : index
    %c0_21 = arith.constant 0 : index
    %21 = vector.load %arg6[%c1_19, %c2_20, %c0_21] : memref<6x16x128xf32, #tpu.memory_space<vmem>>, vector<4x8x128xf32>
    %22 = vector.shape_cast %21 : vector<4x8x128xf32> to vector<32x128xf32>
    %23 = tpu.concatenate %18, %20, %22 in 1 : vector<32x128xf32>, vector<32x128xf32>, vector<32x128xf32> -> vector<32x384xf32>
    %c1_22 = arith.constant 1 : index
    %c0_23 = arith.constant 0 : index
    %c0_24 = arith.constant 0 : index
    %24 = vector.load %arg3[%c1_22, %c0_23, %c0_24] : memref<3x384x128xf32, #tpu.memory_space<vmem>>, vector<1x384x128xf32>
    %25 = vector.shape_cast %24 : vector<1x384x128xf32> to vector<384x128xf32>
    %cst_25 = arith.constant dense<0.000000e+00> : vector<32x128xf32>
    %26 = tpu.matmul %23, %25, %cst_25 {dimension_numbers = #tpu.dot_dimension_numbers<[1], [0], [0], [1], [0, 0, 1, 1], [], []>} : vector<32x384xf32>, vector<384x128xf32>, vector<32x128xf32> -> vector<32x128xf32>
    %27 = arith.addf %16, %26 : vector<32x128xf32>
    %c2_26 = arith.constant 2 : index
    %c0_27 = arith.constant 0 : index
    %c0_28 = arith.constant 0 : index
    %28 = vector.load %arg6[%c2_26, %c0_27, %c0_28] : memref<6x16x128xf32, #tpu.memory_space<vmem>>, vector<4x8x128xf32>
    %29 = vector.shape_cast %28 : vector<4x8x128xf32> to vector<32x128xf32>
    %c2_29 = arith.constant 2 : index
    %c1_30 = arith.constant 1 : index
    %c0_31 = arith.constant 0 : index
    %30 = vector.load %arg6[%c2_29, %c1_30, %c0_31] : memref<6x16x128xf32, #tpu.memory_space<vmem>>, vector<4x8x128xf32>
    %31 = vector.shape_cast %30 : vector<4x8x128xf32> to vector<32x128xf32>
    %c2_32 = arith.constant 2 : index
    %c2_33 = arith.constant 2 : index
    %c0_34 = arith.constant 0 : index
    %32 = vector.load %arg6[%c2_32, %c2_33, %c0_34] : memref<6x16x128xf32, #tpu.memory_space<vmem>>, vector<4x8x128xf32>
    %33 = vector.shape_cast %32 : vector<4x8x128xf32> to vector<32x128xf32>
    %34 = tpu.concatenate %29, %31, %33 in 1 : vector<32x128xf32>, vector<32x128xf32>, vector<32x128xf32> -> vector<32x384xf32>
    %c2_35 = arith.constant 2 : index
    %c0_36 = arith.constant 0 : index
    %c0_37 = arith.constant 0 : index
    %35 = vector.load %arg3[%c2_35, %c0_36, %c0_37] : memref<3x384x128xf32, #tpu.memory_space<vmem>>, vector<1x384x128xf32>
    %36 = vector.shape_cast %35 : vector<1x384x128xf32> to vector<384x128xf32>
    %cst_38 = arith.constant dense<0.000000e+00> : vector<32x128xf32>
    %37 = tpu.matmul %34, %36, %cst_38 {dimension_numbers = #tpu.dot_dimension_numbers<[1], [0], [0], [1], [0, 0, 1, 1], [], []>} : vector<32x384xf32>, vector<384x128xf32>, vector<32x128xf32> -> vector<32x128xf32>
    %38 = arith.addf %27, %37 : vector<32x128xf32>
    %cst_39 = arith.constant dense<0.000000e+00> : vector<128xf32>
    %39 = vector.multi_reduction <add>, %38, %cst_39 [0] : vector<32x128xf32> to vector<128xf32>
    %40 = vector.shape_cast %39 : vector<128xf32> to vector<1x128xf32>
    %41 = arith.mulf %38, %38 : vector<32x128xf32>
    %cst_40 = arith.constant dense<0.000000e+00> : vector<128xf32>
    %42 = vector.multi_reduction <add>, %41, %cst_40 [0] : vector<32x128xf32> to vector<128xf32>
    %43 = vector.shape_cast %42 : vector<128xf32> to vector<1x128xf32>
    %44 = tpu.concatenate %40, %43 in 0 : vector<1x128xf32>, vector<1x128xf32> -> vector<2x128xf32>
    %c0_41 = arith.constant 0 : index
    %c0_42 = arith.constant 0 : index
    %c0_43 = arith.constant 0 : index
    %c0_44 = arith.constant 0 : index
    %45 = vector.load %arg5[%c0_41, %c0_42, %c0_43, %c0_44] : memref<1x1x2x128xf32, #tpu.memory_space<vmem>>, vector<1x1x2x128xf32>
    %46 = vector.shape_cast %45 : vector<1x1x2x128xf32> to vector<2x128xf32>
    %47 = vector.shape_cast %44 : vector<2x128xf32> to vector<1x1x2x128xf32>
    tpu.vector_store %arg5[%c0_41, %c0_42, %c0_43, %c0_44], %47 {strides = array<i32>} : memref<1x1x2x128xf32, #tpu.memory_space<vmem>>, vector<1x1x2x128xf32>,
    %48 = vector.shape_cast %38 : vector<32x128xf32> to vector<4x8x128xf32>
    %cst_45 = arith.constant 0.000000e+00 : f32
    %49 = vector.broadcast %cst_45 : f32 to vector<4x1x128xf32>
    %cst_46 = arith.constant 0.000000e+00 : f32
    %50 = vector.broadcast %cst_46 : f32 to vector<4x7x128xf32>
    %51 = tpu.concatenate %49, %48, %50 in 1 : vector<4x1x128xf32>, vector<4x8x128xf32>, vector<4x7x128xf32> -> vector<4x16x128xf32>
    %c0_47 = arith.constant 0 : index
    %c0_48 = arith.constant 0 : index
    %c0_49 = arith.constant 0 : index
    %c0_50 = arith.constant 0 : index
    %52 = vector.load %arg4[%c0_47, %c0_48, %c0_49, %c0_50] : memref<1x4x16x128xf32, #tpu.memory_space<vmem>>, vector<1x4x16x128xf32>
    %53 = vector.shape_cast %52 : vector<1x4x16x128xf32> to vector<4x16x128xf32>
    %54 = vector.shape_cast %51 : vector<4x16x128xf32> to vector<1x4x16x128xf32>
    tpu.vector_store %arg4[%c0_47, %c0_48, %c0_49, %c0_50], %54 {strides = array<i32>} : memref<1x4x16x128xf32, #tpu.memory_space<vmem>>, vector<1x4x16x128xf32>,
    return
  }
  func.func @transform_1(%arg0: i32, %arg1: i32) -> (i32, i32, i32) {
    %c0_i32 = arith.constant 0 : i32
    %c0_i32_0 = arith.constant 0 : i32
    %c0_i32_1 = arith.constant 0 : i32
    %c0_i32_2 = arith.constant 0 : i32
    return %c0_i32, %c0_i32_0, %c0_i32_1 : i32, i32, i32
  }
  func.func @transform_2(%arg0: i32, %arg1: i32) -> (i32, i32, i32, i32) {
    %c0_i32 = arith.constant 0 : i32
    %c0_i32_0 = arith.constant 0 : i32
    %c0_i32_1 = arith.constant 0 : i32
    return %arg0, %arg1, %c0_i32, %c0_i32_0 : i32, i32, i32, i32
  }
  func.func @transform_3(%arg0: i32, %arg1: i32) -> (i32, i32, i32, i32) {
    %c0_i32 = arith.constant 0 : i32
    %c0_i32_0 = arith.constant 0 : i32
    %c0_i32_1 = arith.constant 0 : i32
    return %arg0, %arg1, %c0_i32, %c0_i32_0 : i32, i32, i32, i32
  }
}

</mosaic_0001>

<bundles_post_ra>
// kernel: tpu_custom_call.1
= control target key start
LH: loop header
LB: loop body
LE: loop exit
PB: predicated region body
PF: predicated region fallthrough
CT: control target
= control target key end

     0   :  { %s2239_s0 = inlined_call_operand.hbm [shape: f32[2,10,16,128], index: 0, kind: input, shape index: {}]   ;;  %s2240_s1 = inlined_call_operand.hbm [shape: f32[3,384,128], index: 1, kind: input, shape index: {}]   ;;  %s2241_s2 = inlined_call_operand.hbm [shape: f32[2,8,16,128], index: 2, kind: output, shape index: {0}]   ;;  %s2242_s3 = inlined_call_operand.hbm [shape: f32[2,2,2,128], index: 3, kind: output, shape index: {1}]  }
   0x1   :  { %2250 = sst [smem:[#allocation21_spill]] %s2240_s1 }
   0x2   :  { %9 = vsyncpa [#allocation5], 0 }
   0x3   :  { %10 = vsyncpa [#allocation6], 0 }
   0x4   :  { %12 = vsyncpa [#allocation6 + $0x1], 0 }
   0x5   :  { %13 = vsyncpa [#allocation9], 0 }
   0x6   :  { %15 = vsyncpa [#allocation9 + $0x1], 0  ;;  %s1944_s12 = smov 0   ;;  %s1946_s13 = smov 0  }
   0x7   :  { %s1948_s14 = smov 0   ;;  %s1950_s15 = smov 0  }
   0x8   :  { %s1952_s16 = smov 0   ;;  %s1954_s17 = smov 0  }
   0x9   :  { %s1956_s18 = smov 0   ;;  %s1958_s19 = smov 0  }
   0xa LB: > { %2251 = sst [smem:[#allocation18_spill]] %s1910_s18  ;;  %s1096_s20 = sadd.s32 4294967295, %s1914_s19   ;;  %s1914_s19 = sphi %s1958_s19, %s21_s19   ;;  %s1910_s18 = sphi %s1956_s18, %s2266_s18   ;;  %s1906_s17 = sphi %s1954_s17, %s2271_s17   ;;  %s1902_s16 = sphi %s1952_s16, %s2264_s16   ;;  %s1898_s15 = sphi %s1950_s15, %s2270_s15   ;;  %s1894_s14 = sphi %s1948_s14, %s2269_s14   ;;  %s1890_s13 = sphi %s1946_s13, %s2268_s13   ;;  %s1886_s12 = sphi %s1944_s12, %s2267_s12  }
   0xb   : > { %s1097_s21 = sadd.s32 4294967294, %s1914_s19   ;;  %s30_s22 = sadd.s32 1, %s1906_s17 }
   0xc   : > { %s33_s23 = sadd.s32 1, %s1910_s18  ;;  %p31_p0 = scmp.ge.s32.totalorder %s30_s22, 2 }
   0xd   : > { %s63_s24 = sadd.s32 1, %s1894_s14  ;;  %p73_p1 = scmp.ne.s32.totalorder %s1894_s14, %s1890_s13 }
   0xe   : > { %p74_p2 = scmp.eq.s32.totalorder %s1096_s20, 3  ;;  %s2273_s22 = smov (%p31_p0, %s30_s22), 0 }
   0xf   : > { %2252 = sst [smem:[#allocation19_spill]] %s2273_s22  ;;  %s2275_s23 = smov (!%p31_p0, %s33_s23), %s1910_s18 }
  0x10   : > { %s59_s25 = ssub.s32 %s1906_s17, %s2273_s22  ;;  %p1996_p3 = por %p74_p2, %p73_p1 }
  0x11   : > { %p35_p4 = scmp.ge.s32.totalorder %s2275_s23, 2  ;;  %p79_p5 = scmp.ne.s32.totalorder %s1890_s13, %s1886_s12 }
  0x12   : > { %s2253_s26 = scalar_select %p1996_p3, 1, 0 }
  0x13   : > { %p80_p6 = scmp.eq.s32.totalorder %s1097_s21, 3  ;;  %p1098_p7 = scmp.ge.s32.totalorder %s1914_s19, 1 }
  0x14   : > { %s2277_s23 = smov (%p35_p4, %s2275_s23), 0  ;;  %p115_p9 = scmp.lt.s32.totalorder %s1914_s19, 5 }
  0x15   : > { %2254 = sst [smem:[#allocation20_spill]] %s2277_s23  ;;  %p2005_p8 = por %p80_p6, %p79_p5 }
  0x16   : > { %s58_s28 = ssub.s32 %s1910_s18, %s2277_s23  ;;  %p2012_p10 = pnand %p1098_p7, %p115_p9 }
  0x17   : > { %s2255_s27 = scalar_select %p2005_p8, 1, 0 }
  0x18   : > { %s60_s29 = sor.u32 %s59_s25, %s58_s28  ;;  %p2016_p12 = scmp.eq.s32.totalorder %s1096_s20, 0 }
  0x19   : > { %s2256_s30 = scalar_select %p2012_p10, 1, 0 }
  0x1a   : > { %p61_p11 = scmp.eq.s32.totalorder %s60_s29, 0  ;;  %p1646_p13 = pneg %p2012_p10 }
  0x1b   : > { %s2257_s4 = scalar_select %p2016_p12, 1, 0 }
  0x1c   : > { %s2023_s5 = scalar_select %p61_p11, %s1894_s14, %s63_s24  }
  0x1d   : > { %s1916_s6 = smov [#allocation4]   ;;  %p2027_p0 = pnand %p2016_p12, %p1646_p13 }
  0x1e   : > { %s127_s7 = sshll.u32 %s1916_s6, 4  ;;  %s2259_s1 = sld [smem:[#allocation21_spill]]  ;;  %s128_s7 = int_to_ptr.vmem [resolvable:$true] %s127_s7 }
  0x1f   : > { %p1732_p2 = pneg %p2027_p0 }
  0x24   : > { %s1730_s11 = scalar_lea.hbm %s2259_s1, 18432 }
  0x25   : > { %p1731_p1 = scmp.ne.s32.totalorder %s2259_s1, %s1730_s11  ;;  %p1737_p6 = scmp.lt.u32.totalorder %s1730_s11, %s2259_s1 }
  0x27   : > { %p1733_p4 = pnand %p1732_p2, %p1731_p1 }
  0x29   : > { %p1734_p5 = pneg %p1733_p4 }
  0x2b   : > { %p1739_p7 = pnand %p1737_p6, %p1734_p5 }
  0x2d   : > { %1742 = shalt.err (!%p1739_p7)
}
  0x2e   : > { %s1743_s28 = scalar_lea.vmem %s128_s7, 18432  ;;  %p1751_p8 = scmp.lt.s32.totalorder %s128_s7, %s128_s7 }
  0x2f   : > { %p1744_p9 = scmp.ne.s32.totalorder %s128_s7, %s1743_s28  ;;  %p1752_p3 = scmp.lt.s32.totalorder %s1743_s28, %s1743_s28 }
  0x31   : > { %p1746_p11 = pnand %p1744_p9, %p1732_p2  ;;  %p1753_p12 = por %p1752_p3, %p1751_p8 }
  0x33   : > { %p1747_p13 = pneg %p1746_p11 }
  0x35   : > { %p1754_p10 = pnand %p1753_p12, %p1747_p13 }
  0x37   : > { %1757 = shalt.err (!%p1754_p10)
}
  0x38   : > { %s1917_s29 = smov 128   ;;  %s1918_s6 = smov 8  }
  0x39   : > { %1649 = dma.hbm_to_vmem [thread:$0]  (!%p2027_p0), %s2259_s1, 18432, %s128_s7, [#allocation5], %s1917_s29, %s1917_s29, %s1918_s6  }
  0x3a   : > { %p2260_p1 = scmp.ne.s32.totalorder %s2256_s30, 0 }
  0x3b   : > { %p2261_p4 = scmp.ne.s32.totalorder (!%p2260_p1), %s2257_s4, 0 }
  0x3c   : > { %143 = sbr.rel (%p2260_p1) target bundleno = 473 (0x1d9), region = 24 }
  0x43   : > { %1871 = dma.done.wait (%p2261_p4), [#allocation5], 18432  }
  0x44   : > { %1873 = vsyncadd (%p2261_p4), [#allocation5], 4294948864  ;;  %s2054_s11 = sand.u32 1, %s1890_s13   ;;  %s1118_s8 = sshll.u32 %s1898_s15, 6 }
  0x45   : > { %s1102_s20 = sshll.u32 %s2054_s11, 6  ;;  %s1103_s21 = sshll.u32 %s2054_s11, 1 }
  0x46   : > { %s168_s7 = smul.u32 160, %s1902_s16  ;;  %s1919_s24 = smov [#allocation2]  }
  0x47   : > { %s179_s30 = sshll.u32 %s1919_s24, 4  ;;  %s1760_s23 = scalar_lea.hbm %s2239_s0, 5120  ;;  %s180_s30 = int_to_ptr.vmem [resolvable:$true] %s179_s30 }
  0x48   : > { %s169_s25 = sadd.s32 %s1118_s8, %s168_s7 }
  0x49   : > { %s1106_s28 = sshll.u32 %s169_s25, 4 }
  0x4a   : > { %s171_s4 = scalar_lea.hbm %s2239_s0, %s1106_s28 }
  0x4b   : > { %s1758_s9 = scalar_lea.hbm %s171_s4, 1536  ;;  %p1761_p8 = scmp.lt.u32.totalorder %s171_s4, %s2239_s0 }
  0x4c   : > { %p1759_p3 = scmp.ne.s32.totalorder %s171_s4, %s1758_s9  ;;  %p1762_p10 = scmp.lt.u32.totalorder %s1760_s23, %s1758_s9 }
  0x4d   : > { %p1764_p0 = scmp.lt.u32.totalorder %s1758_s9, %s171_s4 }
  0x4e   : > { %p1763_p12 = por %p1762_p10, %p1761_p8 }
  0x50   : > { %p1765_p2 = por %p1764_p0, %p1763_p12 }
  0x52   : > { %p1766_p5 = pnand %p1765_p2, %p1759_p3 }
  0x54   : > { %1769 = shalt.err (!%p1766_p5)  }
  0x55   : > { %s1770_s8 = scalar_lea.vmem %s180_s30, 1536  ;;  %p1775_p7 = scmp.lt.s32.totalorder %s180_s30, %s180_s30 }
  0x56   : > { %p1771_p6 = scmp.ne.s32.totalorder %s180_s30, %s1770_s8  ;;  %p1776_p9 = scmp.lt.s32.totalorder %s1770_s8, %s1770_s8 }
  0x58   : > { %p1777_p11 = por %p1776_p9, %p1775_p7 }
  0x5a   : > { %p1778_p13 = pnand %p1777_p11, %p1771_p6 }
  0x5c   : > { %1781 = shalt.err (!%p1778_p13)  }
  0x5d   : > { %182 = dma.hbm_to_vmem [thread:$0]  %s171_s4, 1536, %s180_s30, [#allocation3] }
  0x5e   : > { %s2069_s1 = scalar_lea.vmem [#allocation7], %s1102_s20  ;;  %s2071_s7 = scalar_lea.vmem [#allocation8], %s1103_s21 }
  0x5f   : > { %1874 = dma.done.wait [#allocation3], 1536 }
  0x60   : > { %1875 = vsyncadd [#allocation3], 4294965760  ;;  %v277_v0 = vld [vmem:[#allocation4 + $0x200] sm:$0xff]  ;;  %v278_v1 = vld [vmem:[#allocation4 + $0x208] sm:$0xff]  ;;  %vm907_vm0 = vcmask 1040384   ;;  %s1119_s18 = sshll.u32 %s1898_s15, 3 }
  0x61   : > { %v293_v2 = vld [vmem:[#allocation4 + $0x280] sm:$0xff]  ;;  %v1426_v3 = vpack.c.bf16 %v278_v1, %v277_v0  ;;  %v294_v4 = vld [vmem:[#allocation4 + $0x288] sm:$0xff]  ;;  %v279_v9 = vld [vmem:[#allocation4 + $0x210] sm:$0xff]  ;;  %s1111_s22 = sshll.u32 %s1902_s16, 4  ;;  %s960_s20 = sshll.u32 %s2069_s1, 4  ;;  %s2142_s20 = int_to_ptr.vmem [resolvable:$true] %s960_s20 }
  0x62   : > { %v261_v5 = vld [vmem:[#allocation4 + $0x180] sm:$0xff]  ;;  %v262_v6 = vld [vmem:[#allocation4 + $0x188] sm:$0xff]  ;;  %v1458_v7 = vpack.c.bf16 %v294_v4, %v293_v2  ;;  %v280_v10 = vld [vmem:[#allocation4 + $0x218] sm:$0xff]  ;;  %s957_s23 = sadd.s32 %s1119_s18, %s1111_s22  ;;  %s939_s28 = scalar_lea.sflag [#allocation6], %s2054_s11 }
  0x63   : > { %v1428_v8 = vpack.c.bf16 %v262_v6, %v261_v5  ;;  %v295_v11 = vld [vmem:[#allocation4 + $0x290] sm:$0xff]  ;;  %1427 = vmatprep.subr.bf16.mxu0 %v1426_v3  ;;  %v1430_v12 = vpack.c.bf16 %v280_v10, %v279_v9  ;;  %v296_v13 = vld [vmem:[#allocation4 + $0x298] sm:$0xff]  ;;  %v281_v18 = vld [vmem:[#allocation4 + $0x220] sm:$0xff]  ;;  %s1112_s21 = sshll.u32 %s957_s23, 7  ;;  %s1782_s29 = scalar_lea.vmem %s2142_s20, 1024 }
  0x64   : > { %v263_v14 = vld [vmem:[#allocation4 + $0x190] sm:$0xff]  ;;  %v264_v15 = vld [vmem:[#allocation4 + $0x198] sm:$0xff]  ;;  %1459 = vmatprep.subr.bf16.mxu1 %v1458_v7  ;;  %v1462_v16 = vpack.c.bf16 %v296_v13, %v295_v11  ;;  %v282_v19 = vld [vmem:[#allocation4 + $0x228] sm:$0xff]  ;;  %s2147_s25 = scalar_lea.hbm %s2241_s2, %s1112_s21  ;;  %p1783_p1 = scmp.ne.s32.totalorder %s2142_s20, %s1782_s29 }
  0x65   : > { %1429 = vmatpush3.bf16.msra.mxu0 %v1428_v8  ;;  %v1432_v17 = vpack.c.bf16 %v264_v15, %v263_v14  ;;  %v297_v20 = vld [vmem:[#allocation4 + $0x2a0] sm:$0xff]  ;;  %1461 = vmatpush3.bf16.msra.mxu1 %v1458_v7  ;;  %v1434_v21 = vpack.c.bf16 %v282_v19, %v281_v18  ;;  %v298_v22 = vld [vmem:[#allocation4 + $0x2a8] sm:$0xff]  ;;  %v283_v26 = vld [vmem:[#allocation4 + $0x230] sm:$0xff]  ;;  %p2262_p4 = scmp.ne.s32.totalorder %s2253_s26, 0  ;;  %s1920_s6 = smov [#allocation7]  }
  0x66   : > { %1431 = vmatprep.subr.bf16.mxu0 %v1430_v12  ;;  %v265_v23 = vld [vmem:[#allocation4 + $0x1a0] sm:$0xff]  ;;  %v266_v24 = vld [vmem:[#allocation4 + $0x1a8] sm:$0xff]  ;;  %1463 = vmatprep.subr.bf16.mxu1 %v1462_v16  ;;  %v1466_v25 = vpack.c.bf16 %v298_v22, %v297_v20  ;;  %v284_v27 = vld [vmem:[#allocation4 + $0x238] sm:$0xff]  ;;  %s1786_s4 = sshll.u32 %s1920_s6, 4  ;;  %s1787_s4 = int_to_ptr.vmem [resolvable:$false] %s1786_s4 }
  0x67   : > { %v299_v28 = vld [vmem:[#allocation4 + $0x2b0] sm:$0xff]  ;;  %v300_v29 = vld [vmem:[#allocation4 + $0x2b8] sm:$0xff]  ;;  %v1436_v30 = vpack.c.bf16 %v266_v24, %v265_v23  ;;  %v1438_v31 = vpack.c.bf16 %v284_v27, %v283_v26  ;;  %v285_v35 = vld [vmem:[#allocation4 + $0x240] sm:$0xff]  ;;  %p1784_p3 = pnand %p1783_p1, %p2262_p4  ;;  %s1788_s9 = scalar_lea.vmem %s1787_s4, 2048 }
  0x68   : > { %v267_v32 = vld [vmem:[#allocation4 + $0x1b0] sm:$0xff]  ;;  %v268_v33 = vld [vmem:[#allocation4 + $0x1b8] sm:$0xff]  ;;  %v1470_v34 = vpack.c.bf16 %v300_v29, %v299_v28  ;;  %v286_v36 = vld [vmem:[#allocation4 + $0x248] sm:$0xff]  ;;  %p1789_p10 = scmp.lt.s32.totalorder %s2142_s20, %s1787_s4  ;;  %p1790_p12 = scmp.lt.s32.totalorder %s1788_s9, %s1782_s29 }
  0x69   : > { %1433 = vmatpush3.bf16.msra.mxu0 %v1432_v17  ;;  %1465 = vmatpush3.bf16.msra.mxu1 %v1462_v16  ;;  %v301_v37 = vld [vmem:[#allocation4 + $0x2c0] sm:$0xff]  ;;  %v302_v38 = vld [vmem:[#allocation4 + $0x2c8] sm:$0xff]  ;;  %v1440_v39 = vpack.c.bf16 %v268_v33, %v267_v32  ;;  %v1442_v40 = vpack.c.bf16 %v286_v36, %v285_v35  ;;  %v287_v44 = vld [vmem:[#allocation4 + $0x250] sm:$0xff]  ;;  %p1785_p8 = pneg %p1784_p3 }
  0x6a   : > { %1435 = vmatprep.subr.bf16.mxu0 %v1434_v21  ;;  %1467 = vmatprep.subr.bf16.mxu1 %v1466_v25  ;;  %v269_v41 = vld [vmem:[#allocation4 + $0x1c0] sm:$0xff]  ;;  %v270_v42 = vld [vmem:[#allocation4 + $0x1c8] sm:$0xff]  ;;  %v1474_v43 = vpack.c.bf16 %v302_v38, %v301_v37  ;;  %v288_v45 = vld [vmem:[#allocation4 + $0x258] sm:$0xff]  ;;  %p1791_p0 = por %p1790_p12, %p1789_p10 }
  0x6b   : > { %v303_v46 = vld [vmem:[#allocation4 + $0x2d0] sm:$0xff]  ;;  %v304_v47 = vld [vmem:[#allocation4 + $0x2d8] sm:$0xff]  ;;  %v1444_v48 = vpack.c.bf16 %v270_v42, %v269_v41  ;;  %v1446_v51 = vpack.c.bf16 %v288_v45, %v287_v44  ;;  %v289_v55 = vld [vmem:[#allocation4 + $0x260] sm:$0xff] }
  0x6c   : > { %v2073_v49 = vld [vmem:[#allocation2 + $0x11] sm:$0xff]  ;;  %v1478_v54 = vpack.c.bf16 %v304_v47, %v303_v46  ;;  %v290_v56 = vld [vmem:[#allocation4 + $0x268] sm:$0xff]  ;;  %v305_v57 = vld [vmem:[#allocation4 + $0x2e0] sm:$0xff]  ;;  %p1792_p2 = pnand %p1791_p0, %p1785_p8 }
  0x6d   : > { %1437 = vmatpush3.bf16.msra.mxu0 %v1436_v30  ;;  %1469 = vmatpush3.bf16.msra.mxu1 %v1466_v25  ;;  %v2075_v50 = vld [vmem:[#allocation2 + $0x12] sm:$0xff]  ;;  %v306_v58 = vld [vmem:[#allocation4 + $0x2e8] sm:$0xff]  ;;  %v1450_v60 = vpack.c.bf16 %v290_v56, %v289_v55  ;;  %v273_v61 = vld [vmem:[#allocation4 + $0x1e0] sm:$0xff] }
  0x6e   : > { %1439 = vmatprep.subr.bf16.mxu0 %v1438_v31  ;;  %1471 = vmatprep.subr.bf16.mxu1 %v1470_v34  ;;  %v271_v52 = vld [vmem:[#allocation4 + $0x1d0] sm:$0xff]  ;;  %v272_v53 = vld [vmem:[#allocation4 + $0x1d8] sm:$0xff]  ;;  %v274_v62 = vld [vmem:[#allocation4 + $0x1e8] sm:$0xff]  ;;  %v1482_v63 = vpack.c.bf16 %v306_v58, %v305_v57 }
  0x6f   : > { %373 = vmatprep.mubr.f32.mxu0 %v2073_v49  ;;  %1344 = vmatprep.mubr.f32.mxu1 %v2075_v50  ;;  %v1448_v59 = vpack.c.bf16 %v272_v53, %v271_v52  ;;  %v291_v0 = vld [vmem:[#allocation4 + $0x270] sm:$0xff]  ;;  %v292_v1 = vld [vmem:[#allocation4 + $0x278] sm:$0xff]  ;;  %v1452_v4 = vpack.c.bf16 %v274_v62, %v273_v61  ;;  %v215_v9 = vld [vmem:[#allocation4 + $0x80] sm:$0xff] }
  0x70   : > { %v307_v2 = vld [vmem:[#allocation4 + $0x2f0] sm:$0xff]  ;;  %v308_v3 = vld [vmem:[#allocation4 + $0x2f8] sm:$0xff]  ;;  %v1454_v5 = vpack.c.bf16 %v292_v1, %v291_v0  ;;  %v216_v10 = vld [vmem:[#allocation4 + $0x88] sm:$0xff] }
  0x71   : > { %1441 = vmatpush3.bf16.msra.mxu0 %v1440_v39  ;;  %1473 = vmatpush3.bf16.msra.mxu1 %v1470_v34  ;;  %v275_v6 = vld [vmem:[#allocation4 + $0x1f0] sm:$0xff]  ;;  %v276_v7 = vld [vmem:[#allocation4 + $0x1f8] sm:$0xff]  ;;  %v1486_v8 = vpack.c.bf16 %v308_v3, %v307_v2  ;;  %v231_v11 = vld [vmem:[#allocation4 + $0x100] sm:$0xff]  ;;  %v1490_v14 = vpack.c.bf16 %v216_v10, %v215_v9 }
  0x72   : > { %1443 = vmatprep.subr.bf16.mxu0 %v1442_v40  ;;  %1475 = vmatprep.subr.bf16.mxu1 %v1474_v43  ;;  %v232_v12 = vld [vmem:[#allocation4 + $0x108] sm:$0xff]  ;;  %v1456_v13 = vpack.c.bf16 %v276_v7, %v275_v6  ;;  %v199_v15 = vld [vmem:[#allocation4] sm:$0xff]  ;;  %v217_v18 = vld [vmem:[#allocation4 + $0x90] sm:$0xff] }
  0x73   : > { %v200_v16 = vld [vmem:[#allocation4 + $0x8] sm:$0xff]  ;;  %v1522_v17 = vpack.c.bf16 %v232_v12, %v231_v11  ;;  %v218_v19 = vld [vmem:[#allocation4 + $0x98] sm:$0xff]  ;;  %v233_v20 = vld [vmem:[#allocation4 + $0x110] sm:$0xff] }
  0x74   : > { %v234_v21 = vld [vmem:[#allocation4 + $0x118] sm:$0xff]  ;;  %v2079_v22 = vld [vmem:[#allocation2 + $0x10] sm:$0xff]  ;;  %v1492_v23 = vpack.c.bf16 %v200_v16, %v199_v15  ;;  %v2081_v24 = vld [vmem:[#allocation2 + $0x22] sm:$0xff]  ;;  %v1494_v25 = vpack.c.bf16 %v218_v19, %v217_v18 }
  0x75   : > { %1445 = vmatpush3.bf16.msra.mxu0 %v1444_v48  ;;  %1477 = vmatpush3.bf16.msra.mxu1 %v1474_v43  ;;  %v201_v26 = vld [vmem:[#allocation4 + $0x10] sm:$0xff]  ;;  %v202_v27 = vld [vmem:[#allocation4 + $0x18] sm:$0xff]  ;;  %v1526_v28 = vpack.c.bf16 %v234_v21, %v233_v20  ;;  %v219_v29 = vld [vmem:[#allocation4 + $0xa0] sm:$0xff] }
  0x76   : > { %1447 = vmatprep.subr.bf16.mxu0 %v1446_v51  ;;  %1479 = vmatprep.subr.bf16.mxu1 %v1478_v54  ;;  %v220_v30 = vld [vmem:[#allocation4 + $0xa8] sm:$0xff]  ;;  %v235_v31 = vld [vmem:[#allocation4 + $0x120] sm:$0xff]  ;;  %v1496_v34 = vpack.c.bf16 %v202_v27, %v201_v26  ;;  %v2089_v36 = vld [vmem:[#allocation2 + $0x32] sm:$0xff] }
  0x77   : > { %v236_v32 = vld [vmem:[#allocation4 + $0x128] sm:$0xff]  ;;  %v2087_v35 = vld [vmem:[#allocation2 + $0x20] sm:$0xff]  ;;  %v1498_v37 = vpack.c.bf16 %v220_v30, %v219_v29  ;;  %v2091_v40 = vld [vmem:[#allocation2 + $0x31] sm:$0xff] }
  0x78   : > { %v2084_v33 = vld [vmem:[#allocation2 + $0x21] sm:$0xff]  ;;  %v1530_v41 = vpack.c.bf16 %v236_v32, %v235_v31  ;;  %v221_v42 = vld [vmem:[#allocation4 + $0xb0] sm:$0xff]  ;;  %v222_v43 = vld [vmem:[#allocation4 + $0xb8] sm:$0xff] }
  0x79   : > { %1449 = vmatpush3.bf16.msra.mxu0 %v1448_v59  ;;  %1481 = vmatpush3.bf16.msra.mxu1 %v1478_v54  ;;  %v203_v38 = vld [vmem:[#allocation4 + $0x20] sm:$0xff]  ;;  %v204_v39 = vld [vmem:[#allocation4 + $0x28] sm:$0xff]  ;;  %v237_v44 = vld [vmem:[#allocation4 + $0x130] sm:$0xff]  ;;  %v1502_v52 = vpack.c.bf16 %v222_v43, %v221_v42 }
  0x7a   : > { %1451 = vmatprep.subr.bf16.mxu0 %v1450_v60  ;;  %1483 = vmatprep.subr.bf16.mxu1 %v1482_v63  ;;  %v238_v45 = vld [vmem:[#allocation4 + $0x138] sm:$0xff]  ;;  %v2096_v46 = vld [vmem:[#allocation2 + $0x42] sm:$0xff]  ;;  %v1500_v47 = vpack.c.bf16 %v204_v39, %v203_v38  ;;  %v2099_v48 = vld [vmem:[#allocation2 + $0x30] sm:$0xff] }
  0x7b   : > { %v195_v51 = vld [vmem:[#allocation2 + $0x2] sm:$0xff]  ;;  %v205_v53 = vld [vmem:[#allocation4 + $0x30] sm:$0xff]  ;;  %v206_v54 = vld [vmem:[#allocation4 + $0x38] sm:$0xff]  ;;  %v1534_v56 = vpack.c.bf16 %v238_v45, %v237_v44 }
  0x7c   : > { %v2101_v55 = vld [vmem:[#allocation2 + $0x41] sm:$0xff]  ;;  %v1504_v61 = vpack.c.bf16 %v206_v54, %v205_v53  ;;  %v241_v6 = vld [vmem:[#allocation4 + $0x150] sm:$0xff]  ;;  %v242_v7 = vld [vmem:[#allocation4 + $0x158] sm:$0xff] }
  0x7d   : > { %1453 = vmatpush3.bf16.msra.mxu0 %v1452_v4  ;;  %1485 = vmatpush3.bf16.msra.mxu1 %v1482_v63  ;;  %v223_v57 = vld [vmem:[#allocation4 + $0xc0] sm:$0xff]  ;;  %v224_v58 = vld [vmem:[#allocation4 + $0xc8] sm:$0xff]  ;;  %v225_v4 = vld [vmem:[#allocation4 + $0xd0] sm:$0xff]  ;;  %v1542_v12 = vpack.c.bf16 %v242_v7, %v241_v6 }
  0x7e   : > { %1455 = vmatprep.subr.bf16.mxu0 %v1454_v5  ;;  %1487 = vmatprep.subr.bf16.mxu1 %v1486_v8  ;;  %v239_v59 = vld [vmem:[#allocation4 + $0x140] sm:$0xff]  ;;  %v240_v60 = vld [vmem:[#allocation4 + $0x148] sm:$0xff]  ;;  %v1506_v63 = vpack.c.bf16 %v224_v58, %v223_v57  ;;  %v226_v5 = vld [vmem:[#allocation4 + $0xd8] sm:$0xff] }
  0x7f   : > { %v2106_v62 = vld [vmem:[#allocation2 + $0x40] sm:$0xff]  ;;  %v208_v1 = vld [vmem:[#allocation4 + $0x48] sm:$0xff]  ;;  %v1538_v3 = vpack.c.bf16 %v240_v60, %v239_v59  ;;  %v1510_v9 = vpack.c.bf16 %v226_v5, %v225_v4  ;;  %v209_v10 = vld [vmem:[#allocation4 + $0x50] sm:$0xff] }
  0x80   : > { %v207_v0 = vld [vmem:[#allocation4 + $0x40] sm:$0xff]  ;;  %v210_v11 = vld [vmem:[#allocation4 + $0x58] sm:$0xff]  ;;  %v244_v16 = vld [vmem:[#allocation4 + $0x168] sm:$0xff] }
  0x81   : > { %1457 = vmatpush3.bf16.msra.mxu0 %v1456_v13  ;;  %1489 = vmatpush3.bf16.msra.mxu1 %v1486_v8  ;;  %v191_v2 = vld [vmem:[#allocation2 + $0x1] sm:$0xff]  ;;  %v1508_v8 = vpack.c.bf16 %v208_v1, %v207_v0  ;;  %v245_v26 = vld [vmem:[#allocation4 + $0x170] sm:$0xff]  ;;  %v246_v27 = vld [vmem:[#allocation4 + $0x178] sm:$0xff] }
  0x82   : > { %1491 = vmatprep.subr.bf16.mxu0 %v1490_v14  ;;  %1523 = vmatprep.subr.bf16.mxu1 %v1522_v17  ;;  %v227_v13 = vld [vmem:[#allocation4 + $0xe0] sm:$0xff]  ;;  %v228_v14 = vld [vmem:[#allocation4 + $0xe8] sm:$0xff]  ;;  %v213_v30 = vld [vmem:[#allocation4 + $0x70] sm:$0xff]  ;;  %v1550_v32 = vpack.c.bf16 %v246_v27, %v245_v26 }
  0x83   : > { %v243_v15 = vld [vmem:[#allocation4 + $0x160] sm:$0xff]  ;;  %v1514_v18 = vpack.c.bf16 %v228_v14, %v227_v13  ;;  %v212_v20 = vld [vmem:[#allocation4 + $0x68] sm:$0xff]  ;;  %v214_v31 = vld [vmem:[#allocation4 + $0x78] sm:$0xff] }
  0x84   : > { %374 = vmatmul.mubr.f32.vlgmr.msra.gmra.mrb[0].mxu0 %v2079_v22  ;;  %1345 = vmatmul.mubr.f32.vlgmr.msra.gmra.mrb[0].mxu1 %v2081_v24  ;;  %v211_v19 = vld [vmem:[#allocation4 + $0x60] sm:$0xff]  ;;  %v1546_v21 = vpack.c.bf16 %v244_v16, %v243_v15  ;;  %v696_v39 = vld [vmem:[#allocation4 + $0x408] sm:$0xff]  ;;  %v698_v53 = vld [vmem:[#allocation4 + $0x418] sm:$0xff] }
  0x85   : > { %1493 = vmatpush3.bf16.msra.mxu0 %v1492_v23  ;;  %1525 = vmatpush3.bf16.msra.mxu1 %v1522_v17  ;;  %v1512_v17 = vpack.c.bf16 %v210_v11, %v209_v10  ;;  %v229_v23 = vld [vmem:[#allocation4 + $0xf0] sm:$0xff]  ;;  %v695_v38 = vld [vmem:[#allocation4 + $0x400] sm:$0xff]  ;;  %v664_v44 = vld [vmem:[#allocation4 + $0x308] sm:$0xff] }
  0x86   : > { %1495 = vmatprep.subr.bf16.mxu0 %v1494_v25  ;;  %1527 = vmatprep.subr.bf16.mxu1 %v1526_v28  ;;  %v230_v25 = vld [vmem:[#allocation4 + $0xf8] sm:$0xff]  ;;  %v663_v43 = vld [vmem:[#allocation4 + $0x300] sm:$0xff]  ;;  %v1586_v45 = vpack.c.bf16 %v696_v39, %v695_v38  ;;  %v665_v57 = vld [vmem:[#allocation4 + $0x310] sm:$0xff] }
  0x87   : > { %378 = vmatprep.mubr.f32.mxu0 %v2084_v33  ;;  %1347 = vmatprep.mubr.f32.mxu1 %v2089_v36  ;;  %v1518_v29 = vpack.c.bf16 %v230_v25, %v229_v23  ;;  %v187_v54 = vld [vmem:[#allocation2] sm:$0xff]  ;;  %v666_v58 = vld [vmem:[#allocation4 + $0x318] sm:$0xff]  ;;  %v700_v1 = vld [vmem:[#allocation4 + $0x428] sm:$0xff] }
  0x88   : > { %379 = vmatmul.mubr.f32.gmra.mrb[2].mxu0 %v2087_v35  ;;  %1348 = vmatmul.mubr.f32.gmra.mrb[2].mxu1 %v2096_v46  ;;  %v699_v0 = vld [vmem:[#allocation4 + $0x420] sm:$0xff]  ;;  %v668_v5 = vld [vmem:[#allocation4 + $0x328] sm:$0xff]  ;;  %v685_v7 = vld [vmem:[#allocation4 + $0x3b0] sm:$0xff] }
  0x89   : > { %1497 = vmatpush3.bf16.msra.mxu0 %v1496_v34  ;;  %383 = vmatprep.mubr.f32.mxu0 %v2091_v40  ;;  %v679_v34 = vld [vmem:[#allocation4 + $0x380] sm:$0xff]  ;;  %v1594_v6 = vpack.c.bf16 %v700_v1, %v699_v0  ;;  %v702_v10 = vld [vmem:[#allocation4 + $0x438] sm:$0xff]  ;;  %v669_v11 = vld [vmem:[#allocation4 + $0x330] sm:$0xff] }
  0x8a   : > { %1529 = vmatpush3.bf16.msra.mxu1 %v1526_v28  ;;  %1499 = vmatprep.subr.bf16.mxu0 %v1498_v37  ;;  %v1516_v28 = vpack.c.bf16 %v212_v20, %v211_v19  ;;  %v680_v37 = vld [vmem:[#allocation4 + $0x388] sm:$0xff]  ;;  %v667_v4 = vld [vmem:[#allocation4 + $0x320] sm:$0xff]  ;;  %v689_v23 = vld [vmem:[#allocation4 + $0x3d0] sm:$0xff] }
  0x8b   : > { %1531 = vmatprep.subr.bf16.mxu1 %v1530_v41  ;;  %1382 = vmatprep.mubr.f32.mxu1 %v195_v51  ;;  %v1554_v42 = vpack.c.bf16 %v680_v37, %v679_v34  ;;  %v682_v51 = vld [vmem:[#allocation4 + $0x398] sm:$0xff]  ;;  %v687_v14 = vld [vmem:[#allocation4 + $0x3c0] sm:$0xff]  ;;  %v688_v15 = vld [vmem:[#allocation4 + $0x3c8] sm:$0xff] }
  0x8c   : > { %384 = vmatmul.mubr.f32.gmra.mrb[4].mxu0 %v2099_v48  ;;  %v704_v16 = vld [vmem:[#allocation4 + $0x448] sm:$0xff]  ;;  %v671_v19 = vld [vmem:[#allocation4 + $0x340] sm:$0xff]  ;;  %v690_v25 = vld [vmem:[#allocation4 + $0x3d8] sm:$0xff] }
  0x8d   : > { %1501 = vmatpush3.bf16.msra.mxu0 %v1500_v47  ;;  %388 = vmatprep.mubr.f32.mxu0 %v2101_v55  ;;  %v681_v47 = vld [vmem:[#allocation4 + $0x390] sm:$0xff]  ;;  %v672_v20 = vld [vmem:[#allocation4 + $0x348] sm:$0xff]  ;;  %v706_v27 = vld [vmem:[#allocation4 + $0x458] sm:$0xff] }
  0x8e   : > { %1533 = vmatpush3.bf16.msra.mxu1 %v1530_v41  ;;  %1503 = vmatprep.subr.bf16.mxu0 %v1502_v52  ;;  %v1520_v41 = vpack.c.bf16 %v214_v31, %v213_v30  ;;  %v697_v52 = vld [vmem:[#allocation4 + $0x410] sm:$0xff]  ;;  %v1558_v59 = vpack.c.bf16 %v682_v51, %v681_v47  ;;  %v674_v30 = vld [vmem:[#allocation4 + $0x358] sm:$0xff]  ;;  %v692_v34 = vld [vmem:[#allocation4 + $0x3e8] sm:$0xff] }
  0x8f   : > { %1535 = vmatprep.subr.bf16.mxu1 %v1534_v56  ;;  %v1590_v60 = vpack.c.bf16 %v698_v53, %v697_v52  ;;  %v705_v26 = vld [vmem:[#allocation4 + $0x450] sm:$0xff]  ;;  %v707_v37 = vld [vmem:[#allocation4 + $0x460] sm:$0xff]  ;;  %v708_v38 = vld [vmem:[#allocation4 + $0x468] sm:$0xff] }
  0x90   : > { %389 = vmatmul.mubr.f32.gmra.mrb[6].mxu0 %v2106_v62  ;;  %v1606_v31 = vpack.c.bf16 %v706_v27, %v705_v26  ;;  %v709_v47 = vld [vmem:[#allocation4 + $0x470] sm:$0xff]  ;;  %v710_v51 = vld [vmem:[#allocation4 + $0x478] sm:$0xff] }
  0x91   : > { %1505 = vmatpush3.bf16.msra.mxu0 %v1504_v61  ;;  %543 = vmatprep.mubr.f32.mxu0 %v191_v2  ;;  %v683_v61 = vld [vmem:[#allocation4 + $0x3a0] sm:$0xff]  ;;  %v1560_v2 = vpack.c.bf16 %v666_v58, %v665_v57  ;;  %v1614_v57 = vpack.c.bf16 %v710_v51, %v709_v47 }
  0x92   : > { %1537 = vmatpush3.bf16.msra.mxu1 %v1534_v56  ;;  %1507 = vmatprep.subr.bf16.mxu0 %v1506_v63  ;;  %v1556_v56 = vpack.c.bf16 %v664_v44, %v663_v43  ;;  %v684_v63 = vld [vmem:[#allocation4 + $0x3a8] sm:$0xff]  ;;  %v693_v44 = vld [vmem:[#allocation4 + $0x3f0] sm:$0xff] }
  0x93   : > { %1539 = vmatprep.subr.bf16.mxu1 %v1538_v3  ;;  %v676_v43 = vld [vmem:[#allocation4 + $0x368] sm:$0xff] }
  0x95   : > { %1509 = vmatpush3.bf16.msra.mxu0 %v1508_v8  ;;  %v686_v8 = vld [vmem:[#allocation4 + $0x3b8] sm:$0xff] }
  0x96   : > { %1541 = vmatpush3.bf16.msra.mxu1 %v1538_v3  ;;  %1511 = vmatprep.subr.bf16.mxu0 %v1510_v9  ;;  %v1562_v3 = vpack.c.bf16 %v684_v63, %v683_v61  ;;  %v701_v9 = vld [vmem:[#allocation4 + $0x430] sm:$0xff] }
  0x97   : > { %1543 = vmatprep.subr.bf16.mxu1 %v1542_v12  ;;  %v1598_v13 = vpack.c.bf16 %v702_v10, %v701_v9  ;;  %v653_v61 = vld [vmem:[#allocation2 + $0x50] sm:$0xff] }
  0x99   : > { %1513 = vmatpush3.bf16.msra.mxu0 %v1512_v17 }
  0x9a   : > { %1545 = vmatpush3.bf16.msra.mxu1 %v1542_v12  ;;  %1515 = vmatprep.subr.bf16.mxu0 %v1514_v18  ;;  %v670_v12 = vld [vmem:[#allocation4 + $0x338] sm:$0xff]  ;;  %v1570_v18 = vpack.c.bf16 %v688_v15, %v687_v14 }
  0x9b   : > { %1547 = vmatprep.subr.bf16.mxu1 %v1546_v21  ;;  %v1568_v17 = vpack.c.bf16 %v670_v12, %v669_v11 }
  0x9d   : > { %1517 = vmatpush3.bf16.msra.mxu0 %v1516_v28  ;;  %v1572_v28 = vpack.c.bf16 %v672_v20, %v671_v19 }
  0x9e   : > { %1549 = vmatpush3.bf16.msra.mxu1 %v1546_v21  ;;  %1519 = vmatprep.subr.bf16.mxu0 %v1518_v29  ;;  %v673_v29 = vld [vmem:[#allocation4 + $0x350] sm:$0xff] }
  0x9f   : > { %1551 = vmatprep.subr.bf16.mxu1 %v1550_v32  ;;  %v1576_v39 = vpack.c.bf16 %v674_v30, %v673_v29 }
  0xa1   : > { %1521 = vmatpush3.bf16.msra.mxu0 %v1520_v41 }
  0xa2   : > { %1553 = vmatpush3.bf16.msra.mxu1 %v1550_v32  ;;  %1555 = vmatprep.subr.bf16.mxu0 %v1554_v42  ;;  %v691_v32 = vld [vmem:[#allocation4 + $0x3e0] sm:$0xff] }
  0xa3   : > { %1587 = vmatprep.subr.bf16.mxu1 %v1586_v45  ;;  %v1578_v41 = vpack.c.bf16 %v692_v34, %v691_v32  ;;  %v675_v42 = vld [vmem:[#allocation4 + $0x360] sm:$0xff] }
  0xa4   : > { %544 = vmatmul.mubr.f32.vlgmr.msra.gmra.mrb[8].mxu0 %v187_v54  ;;  %v1580_v52 = vpack.c.bf16 %v676_v43, %v675_v42  ;;  %v677_v54 = vld [vmem:[#allocation4 + $0x370] sm:$0xff] }
  0xa5   : > { %1383 = vmatmul.mubr.f32.vlgmr.msra.gmra.mrb[0].mxu1 %v2075_v50  ;;  %1557 = vmatpush3.bf16.msra.mxu0 %v1556_v56  ;;  %v1564_v50 = vpack.c.bf16 %v668_v5, %v667_v4  ;;  %v678_v56 = vld [vmem:[#allocation4 + $0x378] sm:$0xff] }
  0xa6   : > { %1589 = vmatpush3.bf16.msra.mxu1 %v1586_v45  ;;  %548 = vmatprep.mubr.f32.mxu0 %v2073_v49  ;;  %v1566_v49 = vpack.c.bf16 %v686_v8, %v685_v7  ;;  %v694_v45 = vld [vmem:[#allocation4 + $0x3f8] sm:$0xff]  ;;  %v1584_v58 = vpack.c.bf16 %v678_v56, %v677_v54 }
  0xa7   : > { %1559 = vmatprep.subr.bf16.mxu0 %v1558_v59  ;;  %1591 = vmatprep.subr.bf16.mxu1 %v1590_v60  ;;  %v1582_v53 = vpack.c.bf16 %v694_v45, %v693_v44  ;;  %v661_v59 = vld [vmem:[#allocation2 + $0x52] sm:$0xff] }
  0xa8   : > { %549 = vmatmul.mubr.f32.gmra.mrb[10].mxu0 %v2079_v22  ;;  %1385 = vmatprep.mubr.f32.mxu1 %v2081_v24  ;;  %v703_v22 = vld [vmem:[#allocation4 + $0x440] sm:$0xff] }
  0xa9   : > { %1561 = vmatpush3.bf16.msra.mxu0 %v1560_v2  ;;  %553 = vmatprep.mubr.f32.mxu0 %v2084_v33  ;;  %v1602_v21 = vpack.c.bf16 %v704_v16, %v703_v22 }
  0xaa   : > { %1593 = vmatpush3.bf16.msra.mxu1 %v1590_v60  ;;  %1563 = vmatprep.subr.bf16.mxu0 %v1562_v3  ;;  %v657_v60 = vld [vmem:[#allocation2 + $0x51] sm:$0xff] }
  0xab   : > { %1595 = vmatprep.subr.bf16.mxu1 %v1594_v6  ;;  %1386 = vmatmul.mubr.f32.gmra.mrb[2].mxu1 %v2089_v36 }
  0xac   : > { %554 = vmatmul.mubr.f32.gmra.mrb[12].mxu0 %v2087_v35  ;;  %1420 = vmatprep.mubr.f32.mxu1 %v2081_v24  ;;  %v1574_v24 = vpack.c.bf16 %v690_v25, %v689_v23 }
  0xad   : > { %1565 = vmatpush3.bf16.msra.mxu0 %v1564_v50  ;;  %558 = vmatprep.mubr.f32.mxu0 %v2091_v40 }
  0xae   : > { %1597 = vmatpush3.bf16.msra.mxu1 %v1594_v6  ;;  %1567 = vmatprep.subr.bf16.mxu0 %v1566_v49 }
  0xaf   : > { %1599 = vmatprep.subr.bf16.mxu1 %v1598_v13 }
  0xb0   : > { %559 = vmatmul.mubr.f32.gmra.mrb[14].mxu0 %v2099_v48 }
  0xb1   : > { %1569 = vmatpush3.bf16.msra.mxu0 %v1568_v17  ;;  %775 = vmatprep.mubr.f32.mxu0 %v2084_v33  ;;  %v1610_v33 = vpack.c.bf16 %v708_v38, %v707_v37 }
  0xb2   : > { %1601 = vmatpush3.bf16.msra.mxu1 %v1598_v13  ;;  %1571 = vmatprep.subr.bf16.mxu0 %v1570_v18 }
  0xb3   : > { %1603 = vmatprep.subr.bf16.mxu1 %v1602_v21 }
  0xb5   : > { %1573 = vmatpush3.bf16.msra.mxu0 %v1572_v28 }
  0xb6   : > { %1605 = vmatpush3.bf16.msra.mxu1 %v1602_v21  ;;  %1575 = vmatprep.subr.bf16.mxu0 %v1574_v24 }
  0xb7   : > { %1607 = vmatprep.subr.bf16.mxu1 %v1606_v31 }
  0xb9   : > { %1577 = vmatpush3.bf16.msra.mxu0 %v1576_v39 }
  0xba   : > { %1609 = vmatpush3.bf16.msra.mxu1 %v1606_v31  ;;  %1579 = vmatprep.subr.bf16.mxu0 %v1578_v41 }
  0xbb   : > { %1611 = vmatprep.subr.bf16.mxu1 %v1610_v33 }
  0xbd   : > { %1581 = vmatpush3.bf16.msra.mxu0 %v1580_v52 }
  0xbe   : > { %1613 = vmatpush3.bf16.msra.mxu1 %v1610_v33  ;;  %1583 = vmatprep.subr.bf16.mxu0 %v1582_v53 }
  0xbf   : > { %1615 = vmatprep.subr.bf16.mxu1 %v1614_v57 }
  0xc1   : > { %1585 = vmatpush3.bf16.msra.mxu0 %v1584_v58 }
  0xc2   : > { %1617 = vmatpush3.bf16.msra.mxu1 %v1614_v57 }
  0xc4   : > { %776 = vmatmul.mubr.f32.vlgmr.msra.gmra.mrb[16].mxu0 %v2087_v35 }
  0xc5   : > { %1421 = vmatmul.mubr.f32.vlgmr.msra.gmra.mrb[0].mxu1 %v2089_v36  ;;  %780 = vmatprep.mubr.f32.mxu0 %v2091_v40 }
  0xc6   : > { %1423 = vmatprep.mubr.f32.mxu1 %v2096_v46 }
  0xc8   : > { %781 = vmatmul.mubr.f32.gmra.mrb[18].mxu0 %v2099_v48 }
  0xc9   : > { %1424 = vmatmul.mubr.f32.gmra.mrb[2].mxu1 %v661_v59  ;;  %785 = vmatprep.mubr.f32.mxu0 %v2101_v55 }
  0xcc   : > { %786 = vmatmul.mubr.f32.gmra.mrb[20].mxu0 %v2106_v62 }
  0xcd   : > { %790 = vmatprep.mubr.f32.mxu0 %v657_v60 }
  0xd0   : > { %791 = vmatmul.mubr.f32.gmra.mrb[22].mxu0 %v653_v61 }
 0x157   : > { %v1152_v63 = vpop.f32.mrb[0].mxu0 }
 0x158   : > { %v1153_v35 = vpop.f32.mrb[1].mxu0 }
 0x159   : > { %v1154_v0 = vadd.f32 %v1153_v35, %v1152_v63 }
 0x15b   : > { %v1155_v36 = vpop.f32.mrb[2].mxu0 }
 0x15c   : > { %v1156_v1 = vpop.f32.mrb[3].mxu0 }
 0x15d   : > { %v1157_v40 = vadd.f32 %v1156_v1, %v1155_v36 }
 0x15f   : > { %v1158_v2 = vpop.f32.mrb[4].mxu0 }
 0x160   : > { %v1159_v46 = vpop.f32.mrb[5].mxu0 }
 0x161   : > { %v1160_v3 = vadd.f32 %v1159_v46, %v1158_v2 }
 0x163   : > { %v1161_v4 = vpop.f32.mrb[6].mxu0 }
 0x164   : > { %v1162_v48 = vpop.f32.mrb[7].mxu0 }
 0x165   : > { %v1163_v5 = vadd.f32 %v1162_v48, %v1161_v4 }
 0x177   : > { %v1216_v6 = vpop.f32.mrb[8].mxu0 }
 0x178   : > { %v1217_v55 = vpop.f32.mrb[9].mxu0 }
 0x179   : > { %v1218_v7 = vadd.f32 %v1217_v55, %v1216_v6 }
 0x17b   : > { %v1621_v8 = vadd.f32 %v1218_v7, %v1154_v0  ;;  %v1219_v62 = vpop.f32.mrb[10].mxu0 }
 0x17c   : > { %v1220_v9 = vpop.f32.mrb[11].mxu0 }
 0x17d   : > { %v1221_v10 = vadd.f32 %v1220_v9, %v1219_v62 }
 0x17f   : > { %v1618_v50 = vadd.f32 %v1221_v10, %v1157_v40  ;;  %v1222_v49 = vpop.f32.mrb[12].mxu0 }
 0x180   : > { %v1223_v11 = vpop.f32.mrb[13].mxu0 }
 0x181   : > { %v1224_v12 = vadd.f32 %v1223_v11, %v1222_v49 }
 0x183   : > { %v1627_v13 = vadd.f32 %v1224_v12, %v1160_v3  ;;  %v1225_v14 = vpop.f32.mrb[14].mxu0 }
 0x184   : > { %v1226_v15 = vpop.f32.mrb[15].mxu0 }
 0x185   : > { %v1227_v22 = vadd.f32 %v1226_v15, %v1225_v14 }
 0x187   : > { %v1624_v16 = vadd.f32 %v1227_v22, %v1163_v5 }
 0x197   : > { %v1280_v17 = vpop.f32.mrb[16].mxu0 }
 0x198   : > { %v1422_v18 = vpop.f32.mrb[0].mxu1  ;;  %v1281_v19 = vpop.f32.mrb[17].mxu0 }
 0x199   : > { %v1282_v20 = vadd.f32 %v1281_v19, %v1280_v17  ;;  %v862_v21 = vpop.f32.mrb[1].mxu1 }
 0x19b   : > { %v1622_v23 = vadd.f32 %v1621_v8, %v1282_v20  ;;  %v1283_v25 = vpop.f32.mrb[18].mxu0 }
 0x19c   : > { %v1425_v26 = vpop.f32.mrb[2].mxu1  ;;  %v1284_v27 = vpop.f32.mrb[19].mxu0 }
 0x19d   : > { %v1623_v28 = vadd.f32 %v1622_v23, %v862_v21  ;;  %v1285_v24 = vadd.f32 %v1284_v27, %v1283_v25  ;;  %v872_v29 = vpop.f32.mrb[3].mxu1 }
 0x19f   : > { %v914_v30 = vrot.slane %v1623_v28, 7  ;;  %v1619_v31 = vadd.f32 %v1618_v50, %v1285_v24  ;;  %v1286_v32 = vpop.f32.mrb[20].mxu0  ;;  %v894_v42 = vmul.f32 %v1623_v28, %v1623_v28 }
 0x1a0   : > { %v1287_v34 = vpop.f32.mrb[21].mxu0 }
 0x1a1   : > { %v922_v37 = vsel %vm907_vm0, 0.0, %v914_v30  ;;  %v926_v38 = vsel %vm907_vm0, %v914_v30, 0.0  ;;  %v1620_v39 = vadd.f32 %v1619_v31, %v1422_v18  ;;  %v1288_v41 = vadd.f32 %v1287_v34, %v1286_v32 }
 0x1a2   : > { %930 = vst [vmem:[%s2069_s1] sm:$0xff] %v922_v37  ;;  %931 = vst [vmem:[%s2069_s1 + $0x8] sm:$0xff] %v926_v38 }
 0x1a3   : > { %v885_v43 = vadd.f32 %v1623_v28, %v1620_v39  ;;  %v895_v33 = vmul.f32 %v1620_v39, %v1620_v39  ;;  %v915_v44 = vrot.slane %v1620_v39, 7  ;;  %v1628_v45 = vadd.f32 %v1627_v13, %v1288_v41  ;;  %v1289_v47 = vpop.f32.mrb[22].mxu0 }
 0x1a4   : > { %v1290_v51 = vpop.f32.mrb[23].mxu0 }
 0x1a5   : > { %v898_v52 = vadd.f32 %v895_v33, %v894_v42  ;;  %v923_v53 = vsel %vm907_vm0, 0.0, %v915_v44  ;;  %v927_v54 = vsel %vm907_vm0, %v915_v44, 0.0  ;;  %v1629_v56 = vadd.f32 %v1628_v45, %v872_v29 }
 0x1a6   : > { %932 = vst [vmem:[%s2069_s1 + $0x10] sm:$0xff] %v923_v53  ;;  %933 = vst [vmem:[%s2069_s1 + $0x18] sm:$0xff] %v927_v54  ;;  %v1291_v57 = vadd.f32 %v1290_v51, %v1289_v47 }
 0x1a7   : > { %v886_v58 = vadd.f32 %v1629_v56, %v885_v43  ;;  %v896_v59 = vmul.f32 %v1629_v56, %v1629_v56  ;;  %v916_v60 = vrot.slane %v1629_v56, 7 }
 0x1a8   : > { %v1625_v61 = vadd.f32 %v1624_v16, %v1291_v57 }
 0x1a9   : > { %v899_v63 = vadd.f32 %v898_v52, %v896_v59  ;;  %v924_v35 = vsel %vm907_vm0, 0.0, %v916_v60  ;;  %v928_v0 = vsel %vm907_vm0, %v916_v60, 0.0 }
 0x1aa   : > { %934 = vst [vmem:[%s2069_s1 + $0x20] sm:$0xff] %v924_v35  ;;  %935 = vst [vmem:[%s2069_s1 + $0x28] sm:$0xff] %v928_v0  ;;  %v1626_v36 = vadd.f32 %v1625_v61, %v1425_v26 }
 0x1ac   : > { %v887_v1 = vadd.f32 %v1626_v36, %v886_v58  ;;  %v897_v40 = vmul.f32 %v1626_v36, %v1626_v36  ;;  %v917_v2 = vrot.slane %v1626_v36, 7 }
 0x1ae   : > { %v888_v46 = vrot.slane %v887_v1, 4  ;;  %v900_v3 = vadd.f32 %v899_v63, %v897_v40  ;;  %v925_v4 = vsel %vm907_vm0, 0.0, %v917_v2  ;;  %v929_v48 = vsel %vm907_vm0, %v917_v2, 0.0 }
 0x1af   : > { %936 = vst [vmem:[%s2069_s1 + $0x30] sm:$0xff] %v925_v4  ;;  %937 = vst [vmem:[%s2069_s1 + $0x38] sm:$0xff] %v929_v48 }
 0x1b0   : > { %v889_v5 = vadd.f32 %v888_v46, %v887_v1  ;;  %v901_v6 = vrot.slane %v900_v3, 4 }
 0x1b1   : > { %1795 = shalt.err (!%p1792_p2)
}
 0x1b2   : > { %s1796_s10 = scalar_lea.hbm %s2147_s25, 1024  ;;  %s1800_s18 = scalar_lea.hbm %s2241_s2, 4096 }
 0x1b3   : > { %p1797_p5 = scmp.ne.s32.totalorder %s2147_s25, %s1796_s10  ;;  %p1801_p9 = scmp.lt.u32.totalorder %s2147_s25, %s2241_s2 }
 0x1b4   : > { %p1802_p11 = scmp.lt.u32.totalorder %s1800_s18, %s1796_s10  ;;  %p1804_p1 = scmp.lt.u32.totalorder %s1796_s10, %s2147_s25 }
 0x1b5   : > { %p1798_p6 = pnand %p1797_p5, %p2262_p4 }
 0x1b6   : > { %p1803_p13 = por %p1802_p11, %p1801_p9 }
 0x1b7   : > { %p1799_p7 = pneg %p1798_p6 }
 0x1b8   : > { %p1805_p3 = por %p1804_p1, %p1803_p13 }
 0x1ba   : > { %p1806_p8 = pnand %p1805_p3, %p1799_p7 }
 0x1bc   : > { %1809 = shalt.err (!%p1806_p8)
}
 0x1bd   : > { %s1921_s21 = smov 128   ;;  %s1922_s24 = smov 8   ;;  %v890_v55 = vrot.slane %v889_v5, 2  ;;  %v902_v7 = vadd.f32 %v901_v6, %v900_v3 }
 0x1be   : > { %1642 = dma.vmem_to_hbm [thread:$0]  (%p2262_p4), %s2142_s20, 1024, %s2147_s25, %s939_s28, %s1921_s21, %s1921_s21, %s1922_s24  }
 0x1bf   : > { %s1113_s30 = sshll.u32 %s1902_s16, 1  ;;  %v891_v8 = vadd.f32 %v890_v55, %v889_v5  ;;  %v903_v62 = vrot.slane %v902_v7, 2  ;;  %s978_s4 = sshll.u32 %s2071_s7, 4  ;;  %s2185_s4 = int_to_ptr.vmem [resolvable:$true] %s978_s4 }
 0x1c0   : > { %s974_s29 = sadd.s32 %s1898_s15, %s1113_s30  ;;  %s944_s15 = scalar_lea.sflag [#allocation9], %s2054_s11 }
 0x1c1   : > { %v892_v9 = vrot.slane %v891_v8, 1  ;;  %v904_v10 = vadd.f32 %v903_v62, %v902_v7  ;;  %s1114_s6 = sshll.u32 %s974_s29, 5  ;;  %s1810_s16 = scalar_lea.vmem %s2185_s4, 32 }
 0x1c2   : > { %s2183_s20 = scalar_lea.hbm %s2242_s3, %s1114_s6  ;;  %p1811_p10 = scmp.ne.s32.totalorder %s2185_s4, %s1810_s16 }
 0x1c3   : > { %v905_v50 = vrot.slane %v904_v10, 1  ;;  %v893_v49 = vadd.f32 %v892_v9, %v891_v8  ;;  %s1923_s25 = smov [#allocation8]  }
 0x1c4   : > { %p1812_p12 = pnand %p1811_p10, %p2262_p4  ;;  %s1814_s28 = sshll.u32 %s1923_s25, 4  ;;  %s1815_s28 = int_to_ptr.vmem [resolvable:$false] %s1814_s28 }
 0x1c5   : > { %v906_v11 = vadd.f32 %v905_v50, %v904_v10  ;;  %s1816_s8 = scalar_lea.vmem %s1815_s28, 64  ;;  %p1817_p2 = scmp.lt.s32.totalorder %s2185_s4, %s1815_s28 }
 0x1c6   : > { %p1813_p0 = pneg %p1812_p12  ;;  %p1818_p5 = scmp.lt.s32.totalorder %s1816_s8, %s1810_s16 }
 0x1c7   : > { %v908_v12 = vsel %vm907_vm0, %v893_v49, %v906_v11 }
 0x1c8   : > { %909 = vst [vmem:[%s2071_s7] sm:$0x3] %v908_v12  ;;  %p1819_p6 = por %p1818_p5, %p1817_p2 }
 0x1ca   : > { %p1820_p7 = pnand %p1819_p6, %p1813_p0 }
 0x1cc   : > { %1823 = shalt.err (!%p1820_p7)
}
 0x1cd   : > { %s1824_s11 = scalar_lea.hbm %s2183_s20, 32  ;;  %s1828_s18 = scalar_lea.hbm %s2242_s3, 128 }
 0x1ce   : > { %p1825_p9 = scmp.ne.s32.totalorder %s2183_s20, %s1824_s11  ;;  %p1829_p1 = scmp.lt.u32.totalorder %s2183_s20, %s2242_s3 }
 0x1cf   : > { %p1830_p3 = scmp.lt.u32.totalorder %s1828_s18, %s1824_s11  ;;  %p1832_p10 = scmp.lt.u32.totalorder %s1824_s11, %s2183_s20 }
 0x1d0   : > { %p1826_p11 = pnand %p1825_p9, %p2262_p4 }
 0x1d1   : > { %p1831_p8 = por %p1830_p3, %p1829_p1 }
 0x1d2   : > { %p1827_p13 = pneg %p1826_p11 }
 0x1d3   : > { %p1833_p12 = por %p1832_p10, %p1831_p8 }
 0x1d5   : > { %p1834_p0 = pnand %p1833_p12, %p1827_p13 }
 0x1d7   : > { %1837 = shalt.err (!%p1834_p0)
}
 0x1d8   : > { %1643 = dma.vmem_to_hbm [thread:$0]  (%p2262_p4), %s2185_s4, 32, %s2183_s20, %s944_s15  }
 0x1d9 PF: > { %p1659_p2 = scmp.ge.s32.totalorder %s1914_s19, 2  ;;  %s990_s21 = sand.u32 1, %s1886_s12  }
 0x1da   : > { %p2263_p5 = scmp.ne.s32.totalorder %s2255_s27, 0  ;;  %s991_s24 = scalar_lea.sflag [#allocation6], %s990_s21 }
 0x1dc   : > { %p1651_p6 = pnand %p1659_p2, %p2263_p5 }
 0x1de   : > { %1877 = dma.done.wait (!%p1651_p6), %s991_s24, 1024  }
 0x1df   : > { %1879 = vsyncadd (!%p1651_p6), %s991_s24, 4294966272  ;;  %s1000_s30 = scalar_lea.sflag [#allocation9], %s990_s21 }
 0x1e0   : > { %1881 = dma.done.wait (!%p1651_p6), %s1000_s30, 32  }
 0x1e1   : > { %1883 = vsyncadd (!%p1651_p6), %s1000_s30, 4294967264  ;;  %s21_s19 = sadd.s32 1, %s1914_s19   ;;  %s2264_s16 = sld [smem:[#allocation18_spill]] }
 0x1e2   : > { %p18_p7 = scmp.ge.s32.totalorder %s21_s19, 6   ;;  %s2265_s26 = sld [smem:[#allocation19_spill]] }
 0x1e3   : > { %s2266_s18 = sld [smem:[#allocation20_spill]]  ;;  %s2267_s12 = smov %s1890_s13 }
 0x1e4   : > { %s2268_s13 = smov %s1894_s14  ;;  %s2269_s14 = smov %s2023_s5 }
 0x1e5   : > { %s2270_s15 = smov %s1906_s17  ;;  %20 = sbr.rel (!%p18_p7) target bundleno = 10 (0xa), region = 87 }
 0x1e8   : > { %s2271_s17 = smov %s2265_s26 }
 0x1ec   :  { %1005 = vsyncpa [#allocation5], 1 }
 0x1ed   :  { %1007 = vsyncpa [#allocation5 + $0x1], 1 }
 0x1ee   :  { %1008 = vsyncpa [#allocation6], 1 }
 0x1ef   :  { %1010 = vsyncpa [#allocation6 + $0x1], 1 }
 0x1f0   :  { %1011 = vsyncpa [#allocation9], 1 }
 0x1f1   :  { %1013 = vsyncpa [#allocation9 + $0x1], 1 }
 0x1f2   :  { %1014 = vsyncmov [#allocation3] }
 0x1f5   :  { %s1015_s27 = vpop.sfrf %1014 }
 0x1f6   :  { %p1117_p4 = scmp.ne.s32.totalorder %s1015_s27, 0 }
 0x1f8   :  { %1019 = shalt.err (%p1117_p4)  }

</bundles_post_ra>
